<compile_context>
chip_gen: v5e
topology: v5e:2x2
jax: 0.10.0
libtpu: 0.0.40
codegen_flags: <defaults>
</compile_context>

<pallas_src>
import functools

import jax
import jax.numpy as jnp
from jax.experimental import pallas as pl
from jax.experimental.pallas import tpu as pltpu

EPS = 1e-5  # nn.BatchNorm2d default


def _choose_spatial_tile(hw: int, max_tile: int = 8192) -> int:
    """Largest tile that divides hw, is a multiple of 128 and <= max_tile.

    Falls back to the full extent (always a legal BlockSpec dimension).
    """
    if hw <= max_tile:
        return hw
    t = max_tile - (max_tile % 128)
    while t >= 128:
        if hw % t == 0:
            return t
        t -= 128
    return hw


def bn_stats_kernel(x_ref, sum_ref, ssq_ref):
    """Accumulate per-channel sum and sum-of-squares over (N, H*W).

    x_ref  : (1, C, T)  tile of x viewed as (N, C, H*W)
    sum_ref: (1, C)     resident accumulator (same block every grid step)
    ssq_ref: (1, C)     resident accumulator
    """
    @pl.when((pl.program_id(0) == 0) & (pl.program_id(1) == 0))
    def _():
        sum_ref[...] = jnp.zeros_like(sum_ref)
        ssq_ref[...] = jnp.zeros_like(ssq_ref)

    x = x_ref[0].astype(jnp.float32)                 # (C, T)
    sum_ref[...] += jnp.sum(x, axis=1)[None, :]      # lane reduction -> XLU slot
    ssq_ref[...] += jnp.sum(x * x, axis=1)[None, :]


def cbn_apply_kernel(x_ref, scale_ref, bias_ref, o_ref):
    """out = x * scale[n, c] + bias[n, c]  (BN + conditional affine pre-folded)."""
    x = x_ref[...].astype(jnp.float32)               # (1, C, T)
    o_ref[...] = (x * scale_ref[...] + bias_ref[...]).astype(o_ref.dtype)


@jax.jit
def conditional_batchnorm2d_forward(x, y, embed_weight):
    """x: (N, C, H, W); y: (N,) int class ids; embed_weight: (num_classes, 2*C).

    Returns (N, C, H, W), matching ConditionalBatchNorm2d.forward in train mode.
    """
    N, C, H, W = x.shape
    HW = H * W
    T = _choose_spatial_tile(HW)
    num_t = HW // T

    xr = x.reshape(N, C, HW)                         # free reshape, no transpose
    nbytes_x = x.size * x.dtype.itemsize

    # ---- Phase 1: per-channel sum / sumsq over (N, H*W) --------------------
    sums, ssqs = pl.pallas_call(
        bn_stats_kernel,
        grid=(N, num_t),
        in_specs=[pl.BlockSpec((1, C, T), lambda n, t: (n, 0, t))],
        out_specs=[pl.BlockSpec((1, C), lambda n, t: (0, 0)),
                   pl.BlockSpec((1, C), lambda n, t: (0, 0))],
        out_shape=[jax.ShapeDtypeStruct((1, C), jnp.float32),
                   jax.ShapeDtypeStruct((1, C), jnp.float32)],
        compiler_params=pltpu.CompilerParams(
            dimension_semantics=("arbitrary", "arbitrary"),
            vmem_limit_bytes=32 * 1024 * 1024),
        cost_estimate=pl.CostEstimate(
            flops=3 * x.size, transcendentals=0,
            bytes_accessed=nbytes_x + 2 * C * 4),
    )(xr)

    # ---- Tiny finalize in JAX: fold BN + conditional affine into scale/bias -
    count = jnp.float32(N * HW)
    mean = sums[0] / count                             # (C,)
    var = ssqs[0] / count - mean * mean                # biased var (BN norm)
    rstd = jax.lax.rsqrt(var + EPS)

    gb = jnp.take(embed_weight, y, axis=0).astype(jnp.float32)  # (N, 2C) gather
    gamma, beta = gb[:, :C], gb[:, C:]
    scale = gamma * rstd[None, :]                      # (N, C)
    bias = beta - mean[None, :] * scale                # (N, C)
    scale = scale.reshape(N, C, 1)
    bias = bias.reshape(N, C, 1)

    # ---- Phase 2: lane-dense fused apply (one FMA per element) -------------
    out = pl.pallas_call(
        cbn_apply_kernel,
        grid=(N, num_t),
        in_specs=[pl.BlockSpec((1, C, T), lambda n, t: (n, 0, t)),
                  pl.BlockSpec((1, C, 1), lambda n, t: (n, 0, 0)),
                  pl.BlockSpec((1, C, 1), lambda n, t: (n, 0, 0))],
        out_specs=pl.BlockSpec((1, C, T), lambda n, t: (n, 0, t)),
        out_shape=jax.ShapeDtypeStruct((N, C, HW), x.dtype),
        compiler_params=pltpu.CompilerParams(
            dimension_semantics=("parallel", "parallel"),
            vmem_limit_bytes=32 * 1024 * 1024),
        cost_estimate=pl.CostEstimate(
            flops=2 * x.size, transcendentals=0,
            bytes_accessed=2 * nbytes_x + 2 * N * C * 4),
    )(xr, scale, bias)

    return out.reshape(N, C, H, W)


def reference_forward(x, y, embed_weight):
    """Pure-JAX mirror of the PyTorch module (training-mode batch statistics)."""
    xf = x.astype(jnp.float32)
    mean = jnp.mean(xf, axis=(0, 2, 3), keepdims=True)
    var = jnp.mean((xf - mean) ** 2, axis=(0, 2, 3), keepdims=True)
    xh = (xf - mean) * jax.lax.rsqrt(var + EPS)
    C = x.shape[1]
    gb = embed_weight[y].astype(jnp.float32)
    gamma = gb[:, :C].reshape(-1, C, 1, 1)
    beta = gb[:, C:].reshape(-1, C, 1, 1)
    return gamma * xh + beta


if __name__ == "__main__":
    # Small synthetic config consistent with the module.
    N, C, H, W = 2, 4, 16, 16          # num_features = 4
    num_classes = 3

    key = jax.random.PRNGKey(0)
    kx, ky, ke = jax.random.split(key, 3)
    x = jax.random.normal(kx, (N, C, H, W), dtype=jnp.float32)
    y = jax.random.randint(ky, (N,), 0, num_classes)
    # nn.Embedding init per the module: first C columns ~ N(1, 0.02), rest zero.
    embed_weight = jnp.concatenate(
        [1.0 + 0.02 * jax.random.normal(ke, (num_classes, C), dtype=jnp.float32),
         jnp.zeros((num_classes, C), dtype=jnp.float32)], axis=1)

    out = conditional_batchnorm2d_forward(x, y, embed_weight)
    out = jax.block_until_ready(out)

    ref = reference_forward(x, y, embed_weight)
    assert out.shape == (N, C, H, W)
    err = float(jnp.max(jnp.abs(out - ref)))
    assert jnp.allclose(out, ref, atol=1e-4, rtol=1e-4), err

    print("KERNEL_OK")
</pallas_src>

<mosaic_0001>
module attributes {stable_mosaic.version = 11 : i64} {
  func.func @bn_stats_kernel(%arg0: i32, %arg1: i32, %arg2: memref<1x4x256xf32, #tpu.memory_space<vmem>>, %arg3: memref<1x4xf32, #tpu.memory_space<vmem>>, %arg4: memref<1x4xf32, #tpu.memory_space<vmem>>) attributes {dimension_semantics = [#tpu.dimension_semantics<arbitrary>, #tpu.dimension_semantics<arbitrary>], iteration_bounds = array<i64: 2, 1>, scalar_prefetch = 0 : i64, scratch_operands = 0 : i64, tpu.core_type = #tpu.core_type<tc>, window_params = [{transform_indices = @transform_0, window_bounds = array<i64: 1, 4, 256>}, {pipeline_mode = #tpu.pipeline_mode<synchronous>, transform_indices = @transform_1, window_bounds = array<i64: 1, 4>}, {pipeline_mode = #tpu.pipeline_mode<synchronous>, transform_indices = @transform_2, window_bounds = array<i64: 1, 4>}]} {
    %c0_i32 = arith.constant 0 : i32
    %0 = arith.cmpi eq, %arg0, %c0_i32 : i32
    %c0_i32_0 = arith.constant 0 : i32
    %1 = arith.cmpi eq, %arg1, %c0_i32_0 : i32
    %2 = arith.andi %0, %1 : i1
    %3 = arith.extui %2 : i1 to i32
    %c0_i32_1 = arith.constant 0 : i32
    %4 = arith.cmpi ne, %3, %c0_i32_1 : i32
    scf.if %4 {
      %cst_13 = arith.constant 0.000000e+00 : f32
      %18 = vector.broadcast %cst_13 : f32 to vector<1x4xf32>
      %c0_14 = arith.constant 0 : index
      %c0_15 = arith.constant 0 : index
      %19 = vector.load %arg3[%c0_14, %c0_15] : memref<1x4xf32, #tpu.memory_space<vmem>>, vector<1x4xf32>
      tpu.vector_store %arg3[%c0_14, %c0_15], %18 {strides = array<i32>} : memref<1x4xf32, #tpu.memory_space<vmem>>, vector<1x4xf32>,
      %cst_16 = arith.constant 0.000000e+00 : f32
      %20 = vector.broadcast %cst_16 : f32 to vector<1x4xf32>
      %c0_17 = arith.constant 0 : index
      %c0_18 = arith.constant 0 : index
      %21 = vector.load %arg4[%c0_17, %c0_18] : memref<1x4xf32, #tpu.memory_space<vmem>>, vector<1x4xf32>
      tpu.vector_store %arg4[%c0_17, %c0_18], %20 {strides = array<i32>} : memref<1x4xf32, #tpu.memory_space<vmem>>, vector<1x4xf32>,
    } else {
    }
    %c0 = arith.constant 0 : index
    %c0_2 = arith.constant 0 : index
    %c0_3 = arith.constant 0 : index
    %5 = vector.load %arg2[%c0, %c0_2, %c0_3] : memref<1x4x256xf32, #tpu.memory_space<vmem>>, vector<1x4x256xf32>
    %6 = vector.shape_cast %5 : vector<1x4x256xf32> to vector<4x256xf32>
    %c0_4 = arith.constant 0 : index
    %c0_5 = arith.constant 0 : index
    %7 = vector.load %arg3[%c0_4, %c0_5] : memref<1x4xf32, #tpu.memory_space<vmem>>, vector<1x4xf32>
    %cst = arith.constant dense<0.000000e+00> : vector<4xf32>
    %8 = vector.multi_reduction <add>, %6, %cst [1] : vector<4x256xf32> to vector<4xf32>
    %9 = vector.shape_cast %8 : vector<4xf32> to vector<1x4xf32>
    %10 = arith.addf %7, %9 : vector<1x4xf32>
    %c0_6 = arith.constant 0 : index
    %c0_7 = arith.constant 0 : index
    %11 = vector.load %arg3[%c0_6, %c0_7] : memref<1x4xf32, #tpu.memory_space<vmem>>, vector<1x4xf32>
    tpu.vector_store %arg3[%c0_6, %c0_7], %10 {strides = array<i32>} : memref<1x4xf32, #tpu.memory_space<vmem>>, vector<1x4xf32>,
    %c0_8 = arith.constant 0 : index
    %c0_9 = arith.constant 0 : index
    %12 = vector.load %arg4[%c0_8, %c0_9] : memref<1x4xf32, #tpu.memory_space<vmem>>, vector<1x4xf32>
    %13 = arith.mulf %6, %6 : vector<4x256xf32>
    %cst_10 = arith.constant dense<0.000000e+00> : vector<4xf32>
    %14 = vector.multi_reduction <add>, %13, %cst_10 [1] : vector<4x256xf32> to vector<4xf32>
    %15 = vector.shape_cast %14 : vector<4xf32> to vector<1x4xf32>
    %16 = arith.addf %12, %15 : vector<1x4xf32>
    %c0_11 = arith.constant 0 : index
    %c0_12 = arith.constant 0 : index
    %17 = vector.load %arg4[%c0_11, %c0_12] : memref<1x4xf32, #tpu.memory_space<vmem>>, vector<1x4xf32>
    tpu.vector_store %arg4[%c0_11, %c0_12], %16 {strides = array<i32>} : memref<1x4xf32, #tpu.memory_space<vmem>>, vector<1x4xf32>,
    return
  }
  func.func @transform_0(%arg0: i32, %arg1: i32) -> (i32, i32, i32) {
    %c0_i32 = arith.constant 0 : i32
    %c0_i32_0 = arith.constant 0 : i32
    return %arg0, %c0_i32, %arg1 : i32, i32, i32
  }
  func.func @transform_1(%arg0: i32, %arg1: i32) -> (i32, i32) {
    %c0_i32 = arith.constant 0 : i32
    %c0_i32_0 = arith.constant 0 : i32
    %c0_i32_1 = arith.constant 0 : i32
    return %c0_i32, %c0_i32_0 : i32, i32
  }
  func.func @transform_2(%arg0: i32, %arg1: i32) -> (i32, i32) {
    %c0_i32 = arith.constant 0 : i32
    %c0_i32_0 = arith.constant 0 : i32
    %c0_i32_1 = arith.constant 0 : i32
    return %c0_i32, %c0_i32_0 : i32, i32
  }
}

module attributes {stable_mosaic.version = 11 : i64} {
  func.func @cbn_apply_kernel(%arg0: i32, %arg1: i32, %arg2: memref<1x4x256xf32, #tpu.memory_space<vmem>>, %arg3: memref<1x4x1xf32, #tpu.memory_space<vmem>>, %arg4: memref<1x4x1xf32, #tpu.memory_space<vmem>>, %arg5: memref<1x4x256xf32, #tpu.memory_space<vmem>>) attributes {dimension_semantics = [#tpu.dimension_semantics<parallel>, #tpu.dimension_semantics<parallel>], iteration_bounds = array<i64: 2, 1>, scalar_prefetch = 0 : i64, scratch_operands = 0 : i64, tpu.core_type = #tpu.core_type<tc>, window_params = [{transform_indices = @transform_0, window_bounds = array<i64: 1, 4, 256>}, {transform_indices = @transform_1, window_bounds = array<i64: 1, 4, 1>}, {transform_indices = @transform_2, window_bounds = array<i64: 1, 4, 1>}, {transform_indices = @transform_3, window_bounds = array<i64: 1, 4, 256>}]} {
    %c0 = arith.constant 0 : index
    %c0_0 = arith.constant 0 : index
    %c0_1 = arith.constant 0 : index
    %0 = vector.load %arg2[%c0, %c0_0, %c0_1] : memref<1x4x256xf32, #tpu.memory_space<vmem>>, vector<1x4x256xf32>
    %c0_2 = arith.constant 0 : index
    %c0_3 = arith.constant 0 : index
    %c0_4 = arith.constant 0 : index
    %1 = vector.load %arg3[%c0_2, %c0_3, %c0_4] : memref<1x4x1xf32, #tpu.memory_space<vmem>>, vector<1x4x1xf32>
    %2 = vector.broadcast %1 : vector<1x4x1xf32> to vector<1x4x256xf32>
    %3 = arith.mulf %0, %2 : vector<1x4x256xf32>
    %c0_5 = arith.constant 0 : index
    %c0_6 = arith.constant 0 : index
    %c0_7 = arith.constant 0 : index
    %4 = vector.load %arg4[%c0_5, %c0_6, %c0_7] : memref<1x4x1xf32, #tpu.memory_space<vmem>>, vector<1x4x1xf32>
    %5 = vector.broadcast %4 : vector<1x4x1xf32> to vector<1x4x256xf32>
    %6 = arith.addf %3, %5 : vector<1x4x256xf32>
    %c0_8 = arith.constant 0 : index
    %c0_9 = arith.constant 0 : index
    %c0_10 = arith.constant 0 : index
    %7 = vector.load %arg5[%c0_8, %c0_9, %c0_10] : memref<1x4x256xf32, #tpu.memory_space<vmem>>, vector<1x4x256xf32>
    tpu.vector_store %arg5[%c0_8, %c0_9, %c0_10], %6 {strides = array<i32>} : memref<1x4x256xf32, #tpu.memory_space<vmem>>, vector<1x4x256xf32>,
    return
  }
  func.func @transform_0(%arg0: i32, %arg1: i32) -> (i32, i32, i32) {
    %c0_i32 = arith.constant 0 : i32
    %c0_i32_0 = arith.constant 0 : i32
    return %arg0, %c0_i32, %arg1 : i32, i32, i32
  }
  func.func @transform_1(%arg0: i32, %arg1: i32) -> (i32, i32, i32) {
    %c0_i32 = arith.constant 0 : i32
    %c0_i32_0 = arith.constant 0 : i32
    %c0_i32_1 = arith.constant 0 : i32
    return %arg0, %c0_i32, %c0_i32_0 : i32, i32, i32
  }
  func.func @transform_2(%arg0: i32, %arg1: i32) -> (i32, i32, i32) {
    %c0_i32 = arith.constant 0 : i32
    %c0_i32_0 = arith.constant 0 : i32
    %c0_i32_1 = arith.constant 0 : i32
    return %arg0, %c0_i32, %c0_i32_0 : i32, i32, i32
  }
  func.func @transform_3(%arg0: i32, %arg1: i32) -> (i32, i32, i32) {
    %c0_i32 = arith.constant 0 : i32
    %c0_i32_0 = arith.constant 0 : i32
    return %arg0, %c0_i32, %arg1 : i32, i32, i32
  }
}

</mosaic_0001>

<bundles_post_ra>
// kernel: conditional_batchnorm2d_forward.2
= control target key start
LH: loop header
LB: loop body
LE: loop exit
PB: predicated region body
PF: predicated region fallthrough
CT: control target
= control target key end

     0   :  { %s362_s9 = smov 0   ;;  %s364_s10 = smov 0   ;;  %s416_s0 = inlined_call_operand.vmem [shape: f32[2,4,256], index: 0, kind: input, shape index: {}]   ;;  %s417_s1 = inlined_call_operand.vmem [shape: f32[1,4], index: 1, kind: output, shape index: {0}]   ;;  %s418_s2 = inlined_call_operand.vmem [shape: f32[1,4], index: 2, kind: output, shape index: {1}]  }
   0x1   :  { %s366_s11 = smov 0  }
   0x2 LB: > { %s25_s12 = sadd.s32 1, %s339_s10  ;;  %p285_p0 = scmp.ge.s32.totalorder %s343_s11, 1  ;;  %s343_s11 = sphi %s366_s11, %s13_s11   ;;  %s339_s10 = sphi %s364_s10, %s420_s10   ;;  %s335_s9 = sphi %s362_s9, %s419_s9  }
   0x3   : > { %p27_p1 = scmp.ge.s32.totalorder %s25_s12, 2  ;;  %p124_p2 = scmp.lt.s32.totalorder %s343_s11, 3 }
   0x5   : > { %s422_s12 = smov (%p27_p1, %s25_s12), 0  ;;  %p125_p3 = pnand %p285_p0, %p124_p2 }
   0x6   : > { %p146_p4 = scmp.lt.s32.totalorder (!%p125_p3), %s335_s9, 1  ;;  %p155_p5 = scmp.eq.s32.totalorder (!%p125_p3), %s335_s9, 0 }
   0x7   : > { %128 = sbr.rel (%p125_p3) target bundleno = 418 (0x1a2), region = 24 }
   0xc   : > { %s424_s9 = smov (!%p146_p4, %s335_s9), 1  ;;  %160 = sbr.rel (!%p155_p5) target bundleno = 17 (0x11), region = 28  ;;  %vm161_vm0 = vcmask (%p155_p5), 24576   ;;  %v345_v0 = vmov (%p155_p5), 0.0  }
   0xd   : > { %s291_s13 = sshll.u32 %s424_s9, 3  ;;  %162 = vst.msk [vmem:[%s417_s1] sm:$0x1] (%p155_p5), %vm161_vm0, %v345_v0 }
   0xe   : > { %s153_s16 = scalar_lea.vmem %s416_s0, %s291_s13  ;;  %163 = vst.msk [vmem:[%s418_s2] sm:$0x1] (%p155_p5), %vm161_vm0, %v345_v0 }
  0x11 PF: > { %v164_v1 = vld [vmem:[%s153_s16] sm:$0xff]  ;;  %vm172_vm1 = vcmask 1043456   ;;  %v346_v7 = vmov 0   ;;  %v194_v20 = vlaneseq  ;;  %vm199_vm2 = vcmask 24576  }
  0x12   : > { %167 = vst [vmem:[#allocation1] ss:$2 sm:$0xff] %v164_v1  ;;  %319 = vset.pattern.permute.xlu1 %v346_v7  ;;  %320 = vset.pattern.permute.xlu0 %v346_v7  ;;  %v202_v13 = vmul.f32 %v164_v1, %v164_v1 }
  0x13   : > { %v195_v21 = vand.u32 127, %v194_v20 }
  0x14   : > { %v165_v22 = vld [vmem:[%s417_s1] sm:$0x1] }
  0x15   : > { %v201_v32 = vld [vmem:[%s418_s2] sm:$0x1] }
  0x19   : > { %v168_v2 = vld.sshfl [vmem:[#allocation1] sm:$0xff pattern:$0x75316420]  ;;  %v169_v3 = vld.sshfl [vmem:[#allocation1 + $0x8] sm:$0xff pattern:$0x75316420] }
  0x1a   : > { %v173_v4 = vsel %vm172_vm1, %v168_v2, 0.0  ;;  %v174_v5 = vsel %vm172_vm1, %v169_v3, 0.0 }
  0x1b   : > { %v175_v6 = vadd.f32 %v174_v5, %v173_v4 }
  0x1d   : > { %176 = vadd.xlane.f32.xlu0 %v175_v6 }
  0x90   : > { %v177_v8 = vpop.xlane.xlu0 %176 }
  0x91   : > { %v179_v9 = vperm.slane %v177_v8, 0  ;;  %v180_v10 = vperm.slane %v177_v8, 1  ;;  %v181_v11 = vperm.slane %v177_v8, 2  ;;  %v182_v12 = vperm.slane %v177_v8, 3 }
  0x93   : > { %183 = vst [vmem:[#allocation1] ss:$9 sm:$0xff] %v179_v9 }
  0x94   : > { %185 = vst [vmem:[#allocation1 + $0x1] ss:$9 sm:$0xff] %v180_v10 }
  0x95   : > { %187 = vst [vmem:[#allocation1 + $0x2] ss:$9 sm:$0xff] %v181_v11 }
  0x96   : > { %189 = vst [vmem:[#allocation1 + $0x3] ss:$9 sm:$0xff] %v182_v12 }
  0x9d   : > { %v190_v14 = vld [vmem:[#allocation1] sm:$0xff] }
  0x9e   : > { %192 = vperm.xlu1 %319, %v190_v14   ;;  %204 = vst [vmem:[#allocation1] ss:$2 sm:$0xff] %v202_v13 }
  0xa5   : > { %v205_v15 = vld.sshfl [vmem:[#allocation1] sm:$0xff pattern:$0x75316420]  ;;  %v206_v16 = vld.sshfl [vmem:[#allocation1 + $0x8] sm:$0xff pattern:$0x75316420] }
  0xa6   : > { %v209_v17 = vsel %vm172_vm1, %v205_v15, 0.0  ;;  %v210_v18 = vsel %vm172_vm1, %v206_v16, 0.0 }
  0xa7   : > { %v211_v19 = vadd.f32 %v210_v18, %v209_v17 }
  0xa9   : > { %212 = vadd.xlane.f32.xlu0 %v211_v19 }
 0x110   : > { %v193_v23 = vpop.permute.xlu1 %192 }
 0x111   : > { %v196_v24 = vperm.slane %v193_v23, %v195_v21 }
 0x113   : > { %v198_v25 = vadd.f32 %v196_v24, %v165_v22 }
 0x115   : > { %200 = vst.msk [vmem:[%s417_s1] sm:$0x1] %vm199_vm2, %v198_v25 }
 0x11c   : > { %v213_v26 = vpop.xlane.xlu0 %212 }
 0x11d   : > { %v215_v27 = vperm.slane %v213_v26, 0  ;;  %v216_v28 = vperm.slane %v213_v26, 1  ;;  %v217_v29 = vperm.slane %v213_v26, 2  ;;  %v218_v30 = vperm.slane %v213_v26, 3 }
 0x11f   : > { %219 = vst [vmem:[#allocation1] ss:$9 sm:$0xff] %v215_v27 }
 0x120   : > { %221 = vst [vmem:[#allocation1 + $0x1] ss:$9 sm:$0xff] %v216_v28 }
 0x121   : > { %223 = vst [vmem:[#allocation1 + $0x2] ss:$9 sm:$0xff] %v217_v29 }
 0x122   : > { %225 = vst [vmem:[#allocation1 + $0x3] ss:$9 sm:$0xff] %v218_v30 }
 0x129   : > { %v226_v31 = vld [vmem:[#allocation1] sm:$0xff] }
 0x12a   : > { %228 = vperm.xlu1 %319, %v226_v31  }
 0x19c   : > { %v229_v33 = vpop.permute.xlu1 %228 }
 0x19d   : > { %v230_v34 = vperm.slane %v229_v33, %v195_v21 }
 0x19f   : > { %v232_v35 = vadd.f32 %v230_v34, %v201_v32 }
 0x1a1   : > { %233 = vst.msk [vmem:[%s418_s2] sm:$0x1] %vm199_vm2, %v232_v35 }
 0x1a2 PF: > { %s13_s11 = sadd.s32 1, %s343_s11   ;;  %s419_s9 = smov %s339_s10 }
 0x1a3   : > { %p10_p6 = scmp.ge.s32.totalorder %s13_s11, 4   ;;  %s420_s10 = smov %s422_s12 }
 0x1a5   :  { %12 = sbr.rel (!%p10_p6) target bundleno = 2 (0x2), region = 68 }

// kernel: conditional_batchnorm2d_forward.3
= control target key start
LH: loop header
LB: loop body
LE: loop exit
PB: predicated region body
PF: predicated region fallthrough
CT: control target
= control target key end

     0   :  { %s467_s12 = smov 0   ;;  %s469_s13 = smov 0   ;;  %s506_s0 = inlined_call_operand.vmem [shape: f32[2,4,256], index: 0, kind: input, shape index: {}]   ;;  %s507_s1 = inlined_call_operand.vmem [shape: f32[2,4,1], index: 1, kind: input, shape index: {}]   ;;  %s508_s2 = inlined_call_operand.vmem [shape: f32[2,4,1], index: 2, kind: input, shape index: {}]   ;;  %s509_s3 = inlined_call_operand.vmem [shape: f32[2,4,256], index: 3, kind: output, shape index: {}]  }
   0x1   :  { %s471_s14 = smov 0  }
   0x2 LB: > { %s25_s15 = sadd.s32 1, %s439_s13  ;;  %p383_p0 = scmp.ge.s32.totalorder %s443_s14, 1  ;;  %s443_s14 = sphi %s471_s14, %s13_s14   ;;  %s439_s13 = sphi %s469_s13, %s511_s13   ;;  %s435_s12 = sphi %s467_s12, %s510_s12  }
   0x3   : > { %p27_p1 = scmp.ge.s32.totalorder %s25_s15, 2  ;;  %p176_p2 = scmp.lt.s32.totalorder %s443_s14, 3 }
   0x5   : > { %s513_s15 = smov (%p27_p1, %s25_s15), 0  ;;  %p177_p3 = pnand %p383_p0, %p176_p2 }
   0x6   : > { %p217_p4 = scmp.lt.s32.totalorder (!%p177_p3), %s435_s12, 1 }
   0x7   : > { %180 = sbr.rel (%p177_p3) target bundleno = 144 (0x90), region = 32 }
   0xc   : > { %v445_v0 = vmov 0   ;;  %s515_s12 = smov (!%p217_p4, %s435_s12), 1  ;;  %v446_v3 = vmov 839922192  }
   0xd   : > { %420 = vset.pattern.permute.xlu0 %v445_v0  ;;  %s386_s16 = sshll.u32 %s515_s12, 2  ;;  %v251_v4 = vunpack.c.l.s4 %v446_v3  ;;  %s392_s23 = sshll.u32 %s515_s12, 3 }
   0xe   : > { %s229_s19 = scalar_lea.vmem %s507_s1, %s386_s16  ;;  %s233_s22 = scalar_lea.vmem %s508_s2, %s386_s16 }
   0xf   : > { %v245_v1 = vld [vmem:[%s229_s19] sm:$0xf]  ;;  %v252_v6 = vunpack.c.0.s8 %v251_v4  ;;  %s224_s26 = scalar_lea.vmem %s506_s0, %s392_s23  ;;  %s242_s29 = scalar_lea.vmem %s509_s3, %s392_s23 }
  0x10   : > { %248 = vperm.xlu0 %420, %v245_v1   ;;  %v256_v2 = vld [vmem:[%s233_s22] sm:$0xf] }
  0x11   : > { %v244_v8 = vld [vmem:[%s224_s26] sm:$0xff] }
  0x18   : > { %259 = vperm.xlu0 %420, %v256_v2  }
  0x82   : > { %v249_v5 = vpop.permute.xlu0 %248 }
  0x83   : > { %v253_v7 = vperm.slane %v249_v5, %v252_v6 }
  0x85   : > { %v255_v10 = vmul.f32 %v253_v7, %v244_v8 }
  0x8a   : > { %v260_v9 = vpop.permute.xlu0 %259 }
  0x8b   : > { %v264_v11 = vperm.slane %v260_v9, %v252_v6 }
  0x8d   : > { %v266_v12 = vadd.f32 %v264_v11, %v255_v10 }
  0x8f   : > { %267 = vst [vmem:[%s242_s29] sm:$0xff] %v266_v12 }
  0x90 PF: > { %s13_s14 = sadd.s32 1, %s443_s14   ;;  %s510_s12 = smov %s439_s13 }
  0x91   : > { %p10_p5 = scmp.ge.s32.totalorder %s13_s14, 4   ;;  %s511_s13 = smov %s513_s15 }
  0x93   :  { %12 = sbr.rel (!%p10_p5) target bundleno = 2 (0x2), region = 68 }

</bundles_post_ra>
